<compile_context>
chip_gen: v7x
topology: tpu7x:2x2x1
jax: 0.10.0
libtpu: 0.0.40
codegen_flags: <defaults>
</compile_context>

<pallas_src>
import jax
import jax.numpy as jnp
from jax import lax
from jax.experimental import pallas as pl
from jax.experimental.pallas import tpu as pltpu


def _round_up(n: int, m: int) -> int:
    return ((n + m - 1) // m) * m


def fcdap_kernel(x_ref, w0_ref, b0_ref, w1_ref, b1_ref, w2_ref, b2_ref, o_ref):
    # Activations are kept transposed ([H, tile_b], batch on lanes) so every
    # vreg is fully dense and tanh (single-slot EUP) work is minimal.
    x = x_ref[...]                                               # [tb, D] f32
    # h0[h, b] = sum_d w0[h, d] * x[b, d]                 -> [H0, tb]
    h = lax.dot_general(
        w0_ref[...], x,
        dimension_numbers=(((1,), (1,)), ((), ())),
        preferred_element_type=jnp.float32) + b0_ref[...]
    h = jnp.tanh(h)
    # [H1, tb] = [H1, H0] @ [H0, tb]
    h = jnp.dot(w1_ref[...], h, preferred_element_type=jnp.float32) + b1_ref[...]
    h = jnp.tanh(h)
    # logits_t: [A, tb] = [A, H1] @ [H1, tb]   (lane-dense output block)
    o_ref[...] = (jnp.dot(w2_ref[...], h, preferred_element_type=jnp.float32)
                  + b2_ref[...]).astype(o_ref.dtype)


def fcdap_logits_t(x, params, *, tile_b: int = 8192):
    """Fused MLP forward. x: [B, D] f32 -> lane-dense logits [A, B_pad] f32.

    Valid logits are in columns [:B]; any padded columns come from zero rows
    and should simply be ignored by the consumer.
    """
    assert tile_b % 128 == 0
    B, D = x.shape
    w0, b0, w1, b1, w2, b2 = (params[k] for k in ("w0", "b0", "w1", "b1", "w2", "b2"))
    H0, H1, A = w0.shape[0], w1.shape[0], w2.shape[0]

    # Batch tiling (batch maps to the lane axis of the output):
    #  * small B  -> one 128-rounded lane-dense tile (unmasked vst stores).
    #  * large B  -> roughly-equal tiles of <= tile_b rows, tile count forced
    #    even so v7x's two TensorCores split the "parallel" axis evenly.
    if B <= tile_b:
        num_tiles = 1
        tb = _round_up(max(B, 1), 128)
    else:
        num_tiles = pl.cdiv(B, tile_b)
        if num_tiles % 2:
            num_tiles += 1
        tb = _round_up(pl.cdiv(B, num_tiles), 128)
    B_pad = num_tiles * tb
    if B_pad != B:
        # TODO(synk): a fully copy-free ragged tail needs element-granularity
        # windows (pl.BoundedSlice) or a producer-fused pad; this pad is only
        # taken when B is not already a multiple of the tile size.
        x = jnp.pad(x, ((0, B_pad - B), (0, 0)))

    resident = lambda a: pl.BlockSpec(a.shape, lambda i: (0,) * a.ndim)
    bytes_params = sum(int(a.size) * a.dtype.itemsize
                       for a in (w0, b0, w1, b1, w2, b2))
    bytes_streamed = B_pad * D * x.dtype.itemsize + A * B_pad * 4

    return pl.pallas_call(
        fcdap_kernel,
        out_shape=jax.ShapeDtypeStruct((A, B_pad), jnp.float32),
        grid=(num_tiles,),
        in_specs=[
            pl.BlockSpec((tb, D), lambda i: (i, 0)),     # x: streamed over batch
            resident(w0), resident(b0),                  # params: DMA'd once,
            resident(w1), resident(b1),                  # resident across grid
            resident(w2), resident(b2),
        ],
        out_specs=pl.BlockSpec((A, tb), lambda i: (0, i)),   # lane-dense logits
        compiler_params=pltpu.CompilerParams(
            dimension_semantics=("parallel",)),              # megacore sharding
        cost_estimate=pl.CostEstimate(
            flops=2 * B_pad * (D * H0 + H0 * H1 + H1 * A),
            transcendentals=B_pad * (H0 + H1),
            bytes_accessed=bytes_streamed + bytes_params),
    )(x, w0, b0, w1, b1, w2, b2)


def fcdap_forward(x, params, *, tile_b: int = 8192):
    """Module-compatible forward: [B, D] (or [D]) -> [B, A] logits.

    Prefer consuming fcdap_logits_t's lane-dense [A, B] result directly (e.g.
    argmax / sampling over axis 0); the transpose here exists only for drop-in
    parity with the torch module and slices off padding BEFORE transposing.
    """
    if x.ndim == 1:                       # torch _format: unsqueeze(0)
        x = x[None, :]
    B = x.shape[0]
    out_t = fcdap_logits_t(x, params, tile_b=tile_b)
    return out_t[:, :B].T


def init_params(key, input_dim, output_dim, hidden_dims=(32, 32)):
    """Deterministic init with the PyTorch nn.Linear ([out, in]) layout."""
    dims = (input_dim,) + tuple(hidden_dims) + (output_dim,)
    n_layers = len(dims) - 1
    keys = jax.random.split(key, 2 * n_layers)
    params = {}
    for i in range(n_layers):
        fan_in, fan_out = dims[i], dims[i + 1]
        bound = float(fan_in) ** -0.5
        params[f"w{i}"] = jax.random.uniform(keys[2 * i], (fan_out, fan_in),
                                             minval=-bound, maxval=bound,
                                             dtype=jnp.float32)
        params[f"b{i}"] = jax.random.uniform(keys[2 * i + 1], (fan_out, 1),
                                             minval=-bound, maxval=bound,
                                             dtype=jnp.float32)
    return params


def fcdap_reference(x, params):
    h = jnp.tanh(x @ params["w0"].T + params["b0"].T)
    h = jnp.tanh(h @ params["w1"].T + params["b1"].T)
    return h @ params["w2"].T + params["b2"].T


# TODO(synk): full_pass / select_action sampling (torch.distributions.Categorical)
# is host-side control flow and intentionally not part of the kernel.

if __name__ == "__main__":
    key = jax.random.PRNGKey(0)
    k_param, k_x1, k_x2 = jax.random.split(key, 3)

    input_dim, output_dim = 8, 4
    params = init_params(k_param, input_dim, output_dim, hidden_dims=(32, 32))

    # Small batch: single 128-wide lane-dense tile.
    x_small = jax.random.normal(k_x1, (4, input_dim), dtype=jnp.float32)
    out_small = jax.block_until_ready(fcdap_forward(x_small, params))
    ref_small = fcdap_reference(x_small, params)
    assert out_small.shape == (4, output_dim), out_small.shape
    assert jnp.allclose(out_small, ref_small, atol=1e-4, rtol=1e-4)

    # Ragged batch, default path: one large lane-dense tile (B <= tile_b).
    x_big = jax.random.normal(k_x2, (1027, input_dim), dtype=jnp.float32)
    out_big = jax.block_until_ready(fcdap_forward(x_big, params))
    ref_big = fcdap_reference(x_big, params)
    assert out_big.shape == (1027, output_dim), out_big.shape
    assert jnp.allclose(out_big, ref_big, atol=1e-4, rtol=1e-4)

    # Ragged batch forced through the multi-tile pipelined path (even tile
    # count for the v7x megacore split).
    out_multi = jax.block_until_ready(fcdap_forward(x_big, params, tile_b=256))
    assert out_multi.shape == (1027, output_dim), out_multi.shape
    assert jnp.allclose(out_multi, ref_big, atol=1e-4, rtol=1e-4)

    # Lane-dense consumer path: use the [A, B] logits directly (no transpose).
    logits_t = jax.block_until_ready(fcdap_logits_t(x_big, params))
    assert logits_t.shape[0] == output_dim
    assert jnp.allclose(logits_t[:, :x_big.shape[0]], ref_big.T,
                        atol=1e-4, rtol=1e-4)

    print("KERNEL_OK")
</pallas_src>

<mosaic_0001>
module attributes {stable_mosaic.version = 11 : i64} {
  func.func @fcdap_kernel(%arg0: i32, %arg1: memref<128x8xf32, #tpu.memory_space<vmem>>, %arg2: memref<32x8xf32, #tpu.memory_space<vmem>>, %arg3: memref<32x1xf32, #tpu.memory_space<vmem>>, %arg4: memref<32x32xf32, #tpu.memory_space<vmem>>, %arg5: memref<32x1xf32, #tpu.memory_space<vmem>>, %arg6: memref<4x32xf32, #tpu.memory_space<vmem>>, %arg7: memref<4x1xf32, #tpu.memory_space<vmem>>, %arg8: memref<4x128xf32, #tpu.memory_space<vmem>>) attributes {dimension_semantics = [#tpu.dimension_semantics<parallel>], iteration_bounds = array<i64: 1>, scalar_prefetch = 0 : i64, scratch_operands = 0 : i64, tpu.core_type = #tpu.core_type<tc>, window_params = [{transform_indices = @transform_0, window_bounds = array<i64: 128, 8>}, {pipeline_mode = #tpu.pipeline_mode<synchronous>, transform_indices = @transform_1, window_bounds = array<i64: 32, 8>}, {pipeline_mode = #tpu.pipeline_mode<synchronous>, transform_indices = @transform_2, window_bounds = array<i64: 32, 1>}, {pipeline_mode = #tpu.pipeline_mode<synchronous>, transform_indices = @transform_3, window_bounds = array<i64: 32, 32>}, {pipeline_mode = #tpu.pipeline_mode<synchronous>, transform_indices = @transform_4, window_bounds = array<i64: 32, 1>}, {pipeline_mode = #tpu.pipeline_mode<synchronous>, transform_indices = @transform_5, window_bounds = array<i64: 4, 32>}, {pipeline_mode = #tpu.pipeline_mode<synchronous>, transform_indices = @transform_6, window_bounds = array<i64: 4, 1>}, {transform_indices = @transform_7, window_bounds = array<i64: 4, 128>}]} {
    %c0 = arith.constant 0 : index
    %c0_0 = arith.constant 0 : index
    %0 = vector.load %arg1[%c0, %c0_0] : memref<128x8xf32, #tpu.memory_space<vmem>>, vector<128x8xf32>
    %c0_1 = arith.constant 0 : index
    %c0_2 = arith.constant 0 : index
    %1 = vector.load %arg2[%c0_1, %c0_2] : memref<32x8xf32, #tpu.memory_space<vmem>>, vector<32x8xf32>
    %cst = arith.constant dense<0.000000e+00> : vector<32x128xf32>
    %2 = tpu.matmul %1, %0, %cst {dimension_numbers = #tpu.dot_dimension_numbers<[1], [1], [0], [0], [0, 0, 1, 0], [], []>} : vector<32x8xf32>, vector<128x8xf32>, vector<32x128xf32> -> vector<32x128xf32>
    %c0_3 = arith.constant 0 : index
    %c0_4 = arith.constant 0 : index
    %3 = vector.load %arg3[%c0_3, %c0_4] : memref<32x1xf32, #tpu.memory_space<vmem>>, vector<32x1xf32>
    %4 = vector.broadcast %3 : vector<32x1xf32> to vector<32x128xf32>
    %5 = arith.addf %2, %4 : vector<32x128xf32>
    %6 = math.tanh %5 : vector<32x128xf32>
    %c0_5 = arith.constant 0 : index
    %c0_6 = arith.constant 0 : index
    %7 = vector.load %arg4[%c0_5, %c0_6] : memref<32x32xf32, #tpu.memory_space<vmem>>, vector<32x32xf32>
    %cst_7 = arith.constant dense<0.000000e+00> : vector<32x128xf32>
    %8 = tpu.matmul %7, %6, %cst_7 {dimension_numbers = #tpu.dot_dimension_numbers<[1], [0], [0], [1], [0, 0, 1, 1], [], []>} : vector<32x32xf32>, vector<32x128xf32>, vector<32x128xf32> -> vector<32x128xf32>
    %c0_8 = arith.constant 0 : index
    %c0_9 = arith.constant 0 : index
    %9 = vector.load %arg5[%c0_8, %c0_9] : memref<32x1xf32, #tpu.memory_space<vmem>>, vector<32x1xf32>
    %10 = vector.broadcast %9 : vector<32x1xf32> to vector<32x128xf32>
    %11 = arith.addf %8, %10 : vector<32x128xf32>
    %12 = math.tanh %11 : vector<32x128xf32>
    %c0_10 = arith.constant 0 : index
    %c0_11 = arith.constant 0 : index
    %13 = vector.load %arg6[%c0_10, %c0_11] : memref<4x32xf32, #tpu.memory_space<vmem>>, vector<4x32xf32>
    %cst_12 = arith.constant dense<0.000000e+00> : vector<4x128xf32>
    %14 = tpu.matmul %13, %12, %cst_12 {dimension_numbers = #tpu.dot_dimension_numbers<[1], [0], [0], [1], [0, 0, 1, 1], [], []>} : vector<4x32xf32>, vector<32x128xf32>, vector<4x128xf32> -> vector<4x128xf32>
    %c0_13 = arith.constant 0 : index
    %c0_14 = arith.constant 0 : index
    %15 = vector.load %arg7[%c0_13, %c0_14] : memref<4x1xf32, #tpu.memory_space<vmem>>, vector<4x1xf32>
    %16 = vector.broadcast %15 : vector<4x1xf32> to vector<4x128xf32>
    %17 = arith.addf %14, %16 : vector<4x128xf32>
    %c0_15 = arith.constant 0 : index
    %c0_16 = arith.constant 0 : index
    %18 = vector.load %arg8[%c0_15, %c0_16] : memref<4x128xf32, #tpu.memory_space<vmem>>, vector<4x128xf32>
    tpu.vector_store %arg8[%c0_15, %c0_16], %17 {strides = array<i32>} : memref<4x128xf32, #tpu.memory_space<vmem>>, vector<4x128xf32>,
    return
  }
  func.func @transform_0(%arg0: i32) -> (i32, i32) {
    %c0_i32 = arith.constant 0 : i32
    %c0_i32_0 = arith.constant 0 : i32
    return %arg0, %c0_i32 : i32, i32
  }
  func.func @transform_1(%arg0: i32) -> (i32, i32) {
    %c0_i32 = arith.constant 0 : i32
    %c0_i32_0 = arith.constant 0 : i32
    %c0_i32_1 = arith.constant 0 : i32
    return %c0_i32, %c0_i32_0 : i32, i32
  }
  func.func @transform_2(%arg0: i32) -> (i32, i32) {
    %c0_i32 = arith.constant 0 : i32
    %c0_i32_0 = arith.constant 0 : i32
    %c0_i32_1 = arith.constant 0 : i32
    return %c0_i32, %c0_i32_0 : i32, i32
  }
  func.func @transform_3(%arg0: i32) -> (i32, i32) {
    %c0_i32 = arith.constant 0 : i32
    %c0_i32_0 = arith.constant 0 : i32
    %c0_i32_1 = arith.constant 0 : i32
    return %c0_i32, %c0_i32_0 : i32, i32
  }
  func.func @transform_4(%arg0: i32) -> (i32, i32) {
    %c0_i32 = arith.constant 0 : i32
    %c0_i32_0 = arith.constant 0 : i32
    %c0_i32_1 = arith.constant 0 : i32
    return %c0_i32, %c0_i32_0 : i32, i32
  }
  func.func @transform_5(%arg0: i32) -> (i32, i32) {
    %c0_i32 = arith.constant 0 : i32
    %c0_i32_0 = arith.constant 0 : i32
    %c0_i32_1 = arith.constant 0 : i32
    return %c0_i32, %c0_i32_0 : i32, i32
  }
  func.func @transform_6(%arg0: i32) -> (i32, i32) {
    %c0_i32 = arith.constant 0 : i32
    %c0_i32_0 = arith.constant 0 : i32
    %c0_i32_1 = arith.constant 0 : i32
    return %c0_i32, %c0_i32_0 : i32, i32
  }
  func.func @transform_7(%arg0: i32) -> (i32, i32) {
    %c0_i32 = arith.constant 0 : i32
    %c0_i32_0 = arith.constant 0 : i32
    return %c0_i32, %arg0 : i32, i32
  }
}

</mosaic_0001>

<bundles_post_ra>
// kernel: tpu_custom_call.1
= control target key start
LH: loop header
LB: loop body
LE: loop exit
PB: predicated region body
PF: predicated region fallthrough
CT: control target
= control target key end

     0   :  { %vm71_vm0 = vcmask 64512   ;;  %v676_v6 = vmov 0   ;;  %s882_s0 = inlined_call_operand.vmem [shape: f32[128,8], index: 0, kind: input, shape index: {}]   ;;  %s883_s1 = inlined_call_operand.vmem [shape: f32[32,8], index: 1, kind: input, shape index: {}]   ;;  %s884_s2 = inlined_call_operand.vmem [shape: f32[32,1], index: 2, kind: input, shape index: {}]   ;;  %s885_s3 = inlined_call_operand.vmem [shape: f32[32,32], index: 3, kind: input, shape index: {}]   ;;  %s886_s4 = inlined_call_operand.vmem [shape: f32[32,1], index: 4, kind: input, shape index: {}]   ;;  %s887_s5 = inlined_call_operand.vmem [shape: f32[4,32], index: 5, kind: input, shape index: {}]   ;;  %s888_s6 = inlined_call_operand.vmem [shape: f32[4,1], index: 6, kind: input, shape index: {}]   ;;  %s889_s7 = inlined_call_operand.hbm [shape: f32[4,128], index: 7, kind: output, shape index: {}]  }
   0x1   :  { %v27_v0 = vld [vmem:[%s882_s0] sm:$0xff]  ;;  %v28_v1 = vld [vmem:[%s882_s0 + $0x8] sm:$0xff]  ;;  %v29_v2 = vld [vmem:[%s882_s0 + $0x10] sm:$0xff]  ;;  %634 = vset.pattern.permute.xlu0 %v676_v6  ;;  %635 = vset.pattern.permute.xlu1 %v676_v6 }
   0x2   :  { %v567_v3 = vpack.c.bf16 %v28_v1, %v27_v0  ;;  %vm732_vm1 = vmpackc.low %vm71_vm0, %vm71_vm0  ;;  %v30_v5 = vld [vmem:[%s882_s0 + $0x18] sm:$0xff]  ;;  %v43_v8 = vld [vmem:[%s883_s1] sm:$0xff] }
   0x3   :  { %v573_v7 = vpack.c.bf16 %v30_v5, %v29_v2  ;;  %v31_v9 = vld [vmem:[%s882_s0 + $0x20] sm:$0xff]  ;;  %v32_v10 = vld [vmem:[%s882_s0 + $0x28] sm:$0xff]  ;;  %536 = vmatprep.mubr.msk.f32.mxu0 %vm71_vm0, %v43_v8  ;;  %v49_v12 = vld [vmem:[%s884_s2 + $0x10] sm:$0xff] }
   0x4   :  { %569 = vmatprep.subr.msk.bf16.mxu0 %vm732_vm1, %v567_v3  ;;  %v47_v11 = vld [vmem:[%s884_s2] sm:$0xff]  ;;  %63 = vperm.xlu1 %635, %v49_v12   ;;  %v579_v13 = vpack.c.bf16 %v32_v10, %v31_v9  ;;  %v48_v14 = vld [vmem:[%s884_s2 + $0x8] sm:$0xff]  ;;  %v50_v15 = vld [vmem:[%s884_s2 + $0x18] sm:$0xff] }
   0x5   :  { %572 = vmatpush3.bf16.xpose.msk.msra.mxu0 %vm732_vm1, %v567_v3  ;;  %53 = vperm.xlu0 %634, %v47_v11  }
   0x6   :  { %575 = vmatprep.subr.msk.bf16.mxu0 %vm732_vm1, %v573_v7 }
   0x7   :  { %12 = vsyncpa [#allocation3], 0  ;;  %v225_v16 = vld [vmem:[%s886_s4] sm:$0xff]  ;;  %v33_v17 = vld [vmem:[%s882_s0 + $0x30] sm:$0xff]  ;;  %vm249_vm2 = vcmask 261120   ;;  %v677_v61 = vmov 0.0|0.0  }
   0x8   :  { %68 = vperm.xlu1 %635, %v50_v15   ;;  %v34_v18 = vld [vmem:[%s882_s0 + $0x38] sm:$0xff]  ;;  %v226_v19 = vld [vmem:[%s886_s4 + $0x8] sm:$0xff]  ;;  %v227_v21 = vld [vmem:[%s886_s4 + $0x10] sm:$0xff]  ;;  %vm678_vm3 = vmmov 0   ;;  %v679_v62 = vmov 0.0   ;;  %s680_s16 = smov [#allocation2]  }
   0x9   :  { %58 = vperm.xlu0 %634, %v48_v14   ;;  %v585_v20 = vpack.c.bf16 %v34_v18, %v33_v17  ;;  %v228_v22 = vld [vmem:[%s886_s4 + $0x18] sm:$0xff]  ;;  %v352_v23 = vld [vmem:[%s888_s6] sm:$0xf]  ;;  %v36_v25 = vld [vmem:[%s882_s0 + $0x48] sm:$0xff]  ;;  %s438_s4 = sshll.u32 %s680_s16, 4  ;;  %s439_s4 = int_to_ptr.vmem [resolvable:$true] %s438_s4 }
   0xa   :  { %v35_v24 = vld [vmem:[%s882_s0 + $0x40] sm:$0xff]  ;;  %v37_v27 = vld [vmem:[%s882_s0 + $0x50] sm:$0xff]  ;;  %v38_v28 = vld [vmem:[%s882_s0 + $0x58] sm:$0xff]  ;;  %s652_s17 = scalar_lea.vmem %s439_s4, 64  ;;  %p657_p1 = scmp.lt.s32.totalorder %s439_s4, %s439_s4 }
   0xb   :  { %v591_v26 = vpack.c.bf16 %v36_v25, %v35_v24  ;;  %v597_v29 = vpack.c.bf16 %v38_v28, %v37_v27  ;;  %v39_v30 = vld [vmem:[%s882_s0 + $0x60] sm:$0xff]  ;;  %v40_v31 = vld [vmem:[%s882_s0 + $0x68] sm:$0xff]  ;;  %v41_v33 = vld [vmem:[%s882_s0 + $0x70] sm:$0xff]  ;;  %p653_p0 = scmp.ne.s32.totalorder %s439_s4, %s652_s17  ;;  %p658_p2 = scmp.lt.s32.totalorder %s652_s17, %s652_s17 }
   0xc   :  { %236 = vperm.xlu1 %635, %v226_v19   ;;  %v603_v32 = vpack.c.bf16 %v40_v31, %v39_v30  ;;  %v42_v34 = vld [vmem:[%s882_s0 + $0x78] sm:$0xff]  ;;  %v44_v36 = vld [vmem:[%s883_s1 + $0x8] sm:$0xff]  ;;  %v45_v37 = vld [vmem:[%s883_s1 + $0x10] sm:$0xff] }
   0xd   :  { %578 = vmatpush3.bf16.xpose.msk.msra.mxu0 %vm732_vm1, %v573_v7  ;;  %231 = vperm.xlu0 %634, %v225_v16   ;;  %v609_v35 = vpack.c.bf16 %v42_v34, %v41_v33  ;;  %v46_v38 = vld [vmem:[%s883_s1 + $0x18] sm:$0xff]  ;;  %v221_v39 = vld [vmem:[%s885_s3] sm:$0xff]  ;;  %v222_v58 = vld [vmem:[%s885_s3 + $0x8] sm:$0xff]  ;;  %p659_p3 = por %p658_p2, %p657_p1 }
   0xe   :  { %581 = vmatprep.subr.msk.bf16.mxu0 %vm732_vm1, %v579_v13  ;;  %550 = vmatprep.mubr.msk.f32.mxu1 %vm249_vm2, %v221_v39  ;;  %v223_v59 = vld [vmem:[%s885_s3 + $0x10] sm:$0xff]  ;;  %v224_v60 = vld [vmem:[%s885_s3 + $0x18] sm:$0xff]  ;;  %v351_v17 = vld [vmem:[%s887_s5] sm:$0xf] }
   0xf   :  { %p660_p4 = pnand %p659_p3, %p653_p0 }
  0x10   :  { %246 = vperm.xlu1 %635, %v228_v22  }
  0x11   :  { %241 = vperm.xlu0 %634, %v227_v21  }
  0x15   :  { %584 = vmatpush3.bf16.xpose.msk.msra.mxu0 %vm732_vm1, %v579_v13  ;;  %355 = vperm.xlu0 %634, %v352_v23  }
  0x16   :  { %587 = vmatprep.subr.msk.bf16.mxu0 %vm732_vm1, %v585_v20 }
  0x1d   :  { %590 = vmatpush3.bf16.xpose.msk.msra.mxu0 %vm732_vm1, %v585_v20 }
  0x1e   :  { %593 = vmatprep.subr.msk.bf16.mxu0 %vm732_vm1, %v591_v26 }
  0x25   :  { %596 = vmatpush3.bf16.xpose.msk.msra.mxu0 %vm732_vm1, %v591_v26 }
  0x26   :  { %599 = vmatprep.subr.msk.bf16.mxu0 %vm732_vm1, %v597_v29 }
  0x2d   :  { %602 = vmatpush3.bf16.xpose.msk.msra.mxu0 %vm732_vm1, %v597_v29 }
  0x2e   :  { %605 = vmatprep.subr.msk.bf16.mxu0 %vm732_vm1, %v603_v32 }
  0x35   :  { %608 = vmatpush3.bf16.xpose.msk.msra.mxu0 %vm732_vm1, %v603_v32 }
  0x36   :  { %611 = vmatprep.subr.msk.bf16.mxu0 %vm732_vm1, %v609_v35 }
  0x3d   :  { %614 = vmatpush3.bf16.xpose.msk.msra.mxu0 %vm732_vm1, %v609_v35 }
  0x44   :  { %537 = vmatmul.mubr.msk.f32.vlgmr.msra.gmra.mrb[0].mxu0 %vm71_vm0, %v44_v36 }
  0x45   :  { %539 = vmatprep.mubr.msk.f32.mxu0 %vm71_vm0, %v45_v37 }
  0x48   :  { %540 = vmatmul.mubr.msk.f32.gmra.mrb[2].mxu0 %vm71_vm0, %v46_v38 }
  0x83   :  { %v64_v41 = vpop.permute.xlu1 %63 }
  0x84   :  { %v54_v40 = vpop.permute.xlu0 %53 }
  0x87   :  { %v69_v47 = vpop.permute.xlu1 %68 }
  0x88   :  { %v59_v42 = vpop.permute.xlu0 %58 }
  0x8b   :  { %v237_v63 = vpop.permute.xlu1 %236 }
  0x8c   :  { %v232_v0 = vpop.permute.xlu0 %231 }
  0x8f   :  { %v247_v5 = vpop.permute.xlu1 %246 }
  0x90   :  { %v242_v7 = vpop.permute.xlu0 %241 }
  0x94   :  { %v356_v18 = vpop.permute.xlu0 %355 }
 0x117   :  { %v538_v43 = vpop.f32.mrb[0].mxu0 }
 0x118   :  { %v204_v44 = vadd.f32 %v538_v43, %v59_v42  ;;  %v198_v45 = vpop.f32.mrb[1].mxu0 }
 0x119   :  { %v199_v46 = vadd.f32 %v198_v45, %v54_v40 }
 0x11a   :  { %636 = vtanh.f32 %v204_v44 }
 0x11b   :  { %638 = vtanh.f32 %v199_v46  ;;  %v541_v48 = vpop.f32.mrb[2].mxu0 }
 0x11c   :  { %v214_v49 = vadd.f32 %v541_v48, %v69_v47  ;;  %v208_v50 = vpop.f32.mrb[3].mxu0 }
 0x11d   :  { %v209_v51 = vadd.f32 %v208_v50, %v64_v41 }
 0x11e   :  { %640 = vtanh.f32 %v214_v49 }
 0x11f   :  { %642 = vtanh.f32 %v209_v51 }
 0x124   :  { %v637_v52 = vpop.eup %636 }
 0x125   :  { %v639_v53 = vpop.eup %638 }
 0x126   :  { %v615_v54 = vpack.c.bf16 %v637_v52, %v639_v53 }
 0x128   :  { %v641_v55 = vpop.eup %640  ;;  %616 = vmatprep.subr.bf16.mxu1 %v615_v54 }
 0x129   :  { %v643_v56 = vpop.eup %642  ;;  %618 = vmatpush3.bf16.msra.mxu1 %v615_v54 }
 0x12a   :  { %v619_v57 = vpack.c.bf16 %v641_v55, %v643_v56 }
 0x12c   :  { %620 = vmatprep.subr.bf16.mxu1 %v619_v57 }
 0x12d   :  { %622 = vmatpush3.bf16.msra.mxu1 %v619_v57 }
 0x12e   :  { %623 = vmatprep.subr.bf16.mxu1 %v677_v61 }
 0x130   :  { %551 = vmatmul.mubr.msk.f32.vlgmr.msra.gmra.mrb[0].mxu1 %vm249_vm2, %v222_v58 }
 0x131   :  { %553 = vmatprep.mubr.msk.f32.mxu1 %vm249_vm2, %v223_v59 }
 0x134   :  { %554 = vmatmul.mubr.msk.f32.gmra.mrb[2].mxu1 %vm249_vm2, %v224_v60 }
 0x135   :  { %564 = vmatprep.mubr.msk.f32.mxu1 %vm678_vm3, %v679_v62 }
 0x203   :  { %v552_v1 = vpop.f32.mrb[0].mxu1 }
 0x204   :  { %v334_v2 = vadd.f32 %v552_v1, %v237_v63  ;;  %v328_v3 = vpop.f32.mrb[1].mxu1 }
 0x205   :  { %v329_v4 = vadd.f32 %v328_v3, %v232_v0 }
 0x206   :  { %644 = vtanh.f32 %v334_v2 }
 0x207   :  { %646 = vtanh.f32 %v329_v4  ;;  %v555_v6 = vpop.f32.mrb[2].mxu1 }
 0x208   :  { %v344_v8 = vadd.f32 %v555_v6, %v247_v5  ;;  %v338_v9 = vpop.f32.mrb[3].mxu1 }
 0x209   :  { %v339_v10 = vadd.f32 %v338_v9, %v242_v7 }
 0x20a   :  { %648 = vtanh.f32 %v344_v8 }
 0x20b   :  { %650 = vtanh.f32 %v339_v10 }
 0x210   :  { %v645_v11 = vpop.eup %644 }
 0x211   :  { %v647_v12 = vpop.eup %646 }
 0x212   :  { %v624_v13 = vpack.c.bf16 %v645_v11, %v647_v12 }
 0x214   :  { %v649_v14 = vpop.eup %648  ;;  %625 = vmatpush3.bf16.msra.mxu1 %v624_v13 }
 0x215   :  { %v651_v15 = vpop.eup %650  ;;  %626 = vmatprep.subr.bf16.mxu1 %v677_v61 }
 0x216   :  { %v627_v16 = vpack.c.bf16 %v649_v14, %v651_v15 }
 0x218   :  { %628 = vmatpush3.bf16.msra.mxu1 %v627_v16 }
 0x21b   :  { %565 = vmatmul.mubr.msk.f32.vlgmr.msra.gmra.mrb[4].mxu1 %vm249_vm2, %v351_v17 }
 0x2ee   :  { %v427_v19 = vpop.f32.mrb[4].mxu1 }
 0x2ef   :  { %v428_v20 = vadd.f32 %v427_v19, %v356_v18  ;;  %v566_v21 = vpop.f32.mrb[5].mxu1 }
 0x2f1   :  { %431 = vst [vmem:[#allocation2] sm:$0xf] %v428_v20 }
 0x2f2   :  { %663 = shalt.err (!%p660_p4)
}
 0x2f3   :  { %s664_s5 = scalar_lea.hbm %s889_s7, 64 }
 0x2f4   :  { %p665_p5 = scmp.ne.s32.totalorder %s889_s7, %s664_s5  ;;  %p668_p6 = scmp.lt.u32.totalorder %s664_s5, %s889_s7 }
 0x2f6   :  { %p670_p7 = pnand %p668_p6, %p665_p5 }
 0x2f8   :  { %673 = shalt.err (!%p670_p7)
}
 0x2f9   :  { %441 = dma.vmem_to_hbm [thread:$0]  %s439_s4, 64, %s889_s7, [#allocation3]  }
 0x2fa   :  { %674 = dma.done.wait [#allocation3], 64  }
 0x2fb   :  { %675 = vsyncadd [#allocation3], 4294967232 }
 0x2fc   :  { %445 = vsyncpa [#allocation3], 1 }

</bundles_post_ra>
